<compile_context>
chip_gen: v7x
topology: tpu7x:2x2x1
jax: 0.10.0
libtpu: 0.0.40
codegen_flags: <defaults>
</compile_context>

<pallas_src>
import functools

import jax
import jax.numpy as jnp
from jax.experimental import pallas as pl
from jax.experimental.pallas import tpu as pltpu


def _spinalnet_kernel(
    num_class,
    xa_ref, xb_ref,
    w1_ref, b1_ref,
    w2a_ref, w2b_ref, b2_ref,
    w3a_ref, w3b_ref, b3_ref,
    w4a_ref, w4b_ref, b4_ref,
    wo1_ref, wo2_ref, wo3_ref, wo4_ref, bo_ref,
    out_ref,
):
    cd = w1_ref.dtype                       # compute dtype for MXU operands
    xa = xa_ref[...]
    xb = xb_ref[...]

    def mm(a, w_ref):
        return jnp.dot(a, w_ref[...], preferred_element_type=jnp.float32)

    def relu(v):
        return jnp.maximum(v, 0.0)

    # Spinal stages: concat([a, b]) @ W  ==  a @ Wa + b @ Wb  (weights pre-split).
    x1 = relu(mm(xa, w1_ref) + b1_ref[...]).astype(cd)
    x2 = relu(mm(xb, w2a_ref) + mm(x1, w2b_ref) + b2_ref[...]).astype(cd)
    x3 = relu(mm(xa, w3a_ref) + mm(x2, w3b_ref) + b3_ref[...]).astype(cd)
    x4 = relu(mm(xb, w4a_ref) + mm(x3, w4b_ref) + b4_ref[...]).astype(cd)

    # concat([x1, x2, x3, x4]) @ Wo  ==  sum of per-block matmuls.
    logits = (mm(x1, wo1_ref) + mm(x2, wo2_ref) +
              mm(x3, wo3_ref) + mm(x4, wo4_ref) + bo_ref[...])

    # Mask padded class lanes before the softmax so row sums stay correct.
    col = jax.lax.broadcasted_iota(jnp.int32, logits.shape, 1)
    logits = jnp.where(col < num_class, logits, jnp.float32(-1e30))

    m = jnp.max(logits, axis=1, keepdims=True)
    e = jnp.exp(logits - m)
    denom = jnp.sum(e, axis=1, keepdims=True)
    out_ref[...] = (e * pl.reciprocal(denom, approx=True)).astype(out_ref.dtype)


def _act_map(i):
    return (i, 0)


def _rep_map(i):
    return (0, 0)


def spinalnet_densenet_forward(x, params, half_in_size, num_class,
                               *, compute_dtype=jnp.bfloat16, block_b=None):
    """x: [B, num_ftrs] float32. params: dict of pre-transposed weights/biases
    ([in_features, out_features] weights, [1, out_features] biases)."""
    B = x.shape[0]
    h = half_in_size
    Lw = params["w1"].shape[1]
    nc_pad = pl.cdiv(max(num_class, 1), 128) * 128   # lane-dense output width

    # ---- wrapper-side layout plumbing (free; kernel sees aligned operands) ----
    xa = x[:, :h].astype(compute_dtype)
    xb = x[:, h:2 * h].astype(compute_dtype)

    w2, w3, w4, wo = params["w2"], params["w3"], params["w4"], params["wo"]
    w1 = params["w1"].astype(compute_dtype)
    w2a, w2b = w2[:h].astype(compute_dtype), w2[h:].astype(compute_dtype)
    w3a, w3b = w3[:h].astype(compute_dtype), w3[h:].astype(compute_dtype)
    w4a, w4b = w4[:h].astype(compute_dtype), w4[h:].astype(compute_dtype)

    def pad_classes(m):
        return jnp.pad(m, ((0, 0), (0, nc_pad - num_class)))

    wo1 = pad_classes(wo[0 * Lw:1 * Lw]).astype(compute_dtype)
    wo2 = pad_classes(wo[1 * Lw:2 * Lw]).astype(compute_dtype)
    wo3 = pad_classes(wo[2 * Lw:3 * Lw]).astype(compute_dtype)
    wo4 = pad_classes(wo[3 * Lw:4 * Lw]).astype(compute_dtype)

    b1 = params["b1"].astype(jnp.float32)
    b2 = params["b2"].astype(jnp.float32)
    b3 = params["b3"].astype(jnp.float32)
    b4 = params["b4"].astype(jnp.float32)
    bo = pad_classes(params["bo"]).astype(jnp.float32)

    # ---- batch tiling ---------------------------------------------------------
    if block_b is None:
        block_b = B if B <= 1024 else 1024      # multiple of 8 or == full dim
    tb = block_b
    b_pad = pl.cdiv(B, tb) * tb
    if b_pad != B:
        xa = jnp.pad(xa, ((0, b_pad - B), (0, 0)))
        xb = jnp.pad(xb, ((0, b_pad - B), (0, 0)))
    grid = (b_pad // tb,)

    weights = (w1, b1, w2a, w2b, b2, w3a, w3b, b3, w4a, w4b, b4,
               wo1, wo2, wo3, wo4, bo)

    in_specs = [pl.BlockSpec((tb, h), _act_map),
                pl.BlockSpec((tb, h), _act_map)]
    in_specs += [pl.BlockSpec(tuple(w.shape), _rep_map) for w in weights]

    kernel = functools.partial(_spinalnet_kernel, num_class)
    out = pl.pallas_call(
        kernel,
        out_shape=jax.ShapeDtypeStruct((b_pad, nc_pad), jnp.float32),
        grid=grid,
        in_specs=in_specs,
        out_specs=pl.BlockSpec((tb, nc_pad), _act_map),
        compiler_params=pltpu.CompilerParams(
            dimension_semantics=("parallel",),
            vmem_limit_bytes=32 * 1024 * 1024,
        ),
    )(xa, xb, *weights)
    return out[:B, :num_class]


def init_params(key, half_in_size, layer_width, num_class):
    """PyTorch-Linear-like uniform fan-in init, stored pre-transposed
    as [in_features, out_features]."""
    def linear(key, fan_in, fan_out):
        kw, kb = jax.random.split(key)
        bound = 1.0 / jnp.sqrt(jnp.float32(fan_in))
        w = jax.random.uniform(kw, (fan_in, fan_out), jnp.float32, -bound, bound)
        b = jax.random.uniform(kb, (1, fan_out), jnp.float32, -bound, bound)
        return w, b

    keys = jax.random.split(key, 5)
    w1, b1 = linear(keys[0], half_in_size, layer_width)
    w2, b2 = linear(keys[1], half_in_size + layer_width, layer_width)
    w3, b3 = linear(keys[2], half_in_size + layer_width, layer_width)
    w4, b4 = linear(keys[3], half_in_size + layer_width, layer_width)
    wo, bo = linear(keys[4], layer_width * 4, num_class)
    return dict(w1=w1, b1=b1, w2=w2, b2=b2, w3=w3, b3=b3,
                w4=w4, b4=b4, wo=wo, bo=bo)


def reference_forward(x, params, half_in_size):
    """Plain-JAX reference mirroring the PyTorch forward, for verification."""
    h = half_in_size
    xa, xb = x[:, :h], x[:, h:2 * h]
    relu = lambda v: jnp.maximum(v, 0.0)
    x1 = relu(xa @ params["w1"] + params["b1"])
    x2 = relu(jnp.concatenate([xb, x1], 1) @ params["w2"] + params["b2"])
    x3 = relu(jnp.concatenate([xa, x2], 1) @ params["w3"] + params["b3"])
    x4 = relu(jnp.concatenate([xb, x3], 1) @ params["w4"] + params["b4"])
    feats = jnp.concatenate([x1, x2, x3, x4], 1)
    logits = feats @ params["wo"] + params["bo"]
    return jax.nn.softmax(logits, axis=1)


if __name__ == "__main__":
    # Small shapes consistent with the module: num_ftrs = 2 * half_in_size.
    B = 2
    half_in_size = 16
    layer_width = 32
    num_class = 2
    num_ftrs = 2 * half_in_size

    key = jax.random.PRNGKey(0)
    kx, kp = jax.random.split(key)
    x = jax.random.normal(kx, (B, num_ftrs), jnp.float32)
    params = init_params(kp, half_in_size, layer_width, num_class)

    ref = reference_forward(x, params, half_in_size)

    # f32 compute path (tight-ish check; only approx-reciprocal / MXU rounding).
    out_f32 = spinalnet_densenet_forward(
        x, params, half_in_size, num_class, compute_dtype=jnp.float32)
    out_f32 = jax.block_until_ready(out_f32)
    assert out_f32.shape == (B, num_class)
    assert jnp.allclose(out_f32, ref, atol=1e-2), "f32 kernel mismatch vs reference"
    assert jnp.allclose(jnp.sum(out_f32, axis=1), 1.0, atol=5e-3), "softmax rows must sum to 1"

    # bf16 operands / f32 accumulation (the performance path on v6e/v7x).
    out_bf16 = spinalnet_densenet_forward(
        x, params, half_in_size, num_class, compute_dtype=jnp.bfloat16)
    out_bf16 = jax.block_until_ready(out_bf16)
    assert out_bf16.shape == (B, num_class)
    assert jnp.allclose(out_bf16, ref, atol=5e-2), "bf16 kernel mismatch vs reference"
    assert jnp.allclose(jnp.sum(out_bf16, axis=1), 1.0, atol=5e-3), "softmax rows must sum to 1"

    print("KERNEL_OK")
</pallas_src>

<mosaic_0001>
module attributes {stable_mosaic.version = 11 : i64} {
  func.func @_spinalnet_kernel(%arg0: i32, %arg1: memref<2x16xf32, #tpu.memory_space<vmem>>, %arg2: memref<2x16xf32, #tpu.memory_space<vmem>>, %arg3: memref<16x32xf32, #tpu.memory_space<vmem>>, %arg4: memref<1x32xf32, #tpu.memory_space<vmem>>, %arg5: memref<16x32xf32, #tpu.memory_space<vmem>>, %arg6: memref<32x32xf32, #tpu.memory_space<vmem>>, %arg7: memref<1x32xf32, #tpu.memory_space<vmem>>, %arg8: memref<16x32xf32, #tpu.memory_space<vmem>>, %arg9: memref<32x32xf32, #tpu.memory_space<vmem>>, %arg10: memref<1x32xf32, #tpu.memory_space<vmem>>, %arg11: memref<16x32xf32, #tpu.memory_space<vmem>>, %arg12: memref<32x32xf32, #tpu.memory_space<vmem>>, %arg13: memref<1x32xf32, #tpu.memory_space<vmem>>, %arg14: memref<32x128xf32, #tpu.memory_space<vmem>>, %arg15: memref<32x128xf32, #tpu.memory_space<vmem>>, %arg16: memref<32x128xf32, #tpu.memory_space<vmem>>, %arg17: memref<32x128xf32, #tpu.memory_space<vmem>>, %arg18: memref<1x128xf32, #tpu.memory_space<vmem>>, %arg19: memref<2x128xf32, #tpu.memory_space<vmem>>) attributes {dimension_semantics = [#tpu.dimension_semantics<parallel>], iteration_bounds = array<i64: 1>, scalar_prefetch = 0 : i64, scratch_operands = 0 : i64, tpu.core_type = #tpu.core_type<tc>, window_params = [{transform_indices = @transform_0, window_bounds = array<i64: 2, 16>}, {transform_indices = @transform_1, window_bounds = array<i64: 2, 16>}, {pipeline_mode = #tpu.pipeline_mode<synchronous>, transform_indices = @transform_2, window_bounds = array<i64: 16, 32>}, {pipeline_mode = #tpu.pipeline_mode<synchronous>, transform_indices = @transform_3, window_bounds = array<i64: 1, 32>}, {pipeline_mode = #tpu.pipeline_mode<synchronous>, transform_indices = @transform_4, window_bounds = array<i64: 16, 32>}, {pipeline_mode = #tpu.pipeline_mode<synchronous>, transform_indices = @transform_5, window_bounds = array<i64: 32, 32>}, {pipeline_mode = #tpu.pipeline_mode<synchronous>, transform_indices = @transform_6, window_bounds = array<i64: 1, 32>}, {pipeline_mode = #tpu.pipeline_mode<synchronous>, transform_indices = @transform_7, window_bounds = array<i64: 16, 32>}, {pipeline_mode = #tpu.pipeline_mode<synchronous>, transform_indices = @transform_8, window_bounds = array<i64: 32, 32>}, {pipeline_mode = #tpu.pipeline_mode<synchronous>, transform_indices = @transform_9, window_bounds = array<i64: 1, 32>}, {pipeline_mode = #tpu.pipeline_mode<synchronous>, transform_indices = @transform_10, window_bounds = array<i64: 16, 32>}, {pipeline_mode = #tpu.pipeline_mode<synchronous>, transform_indices = @transform_11, window_bounds = array<i64: 32, 32>}, {pipeline_mode = #tpu.pipeline_mode<synchronous>, transform_indices = @transform_12, window_bounds = array<i64: 1, 32>}, {pipeline_mode = #tpu.pipeline_mode<synchronous>, transform_indices = @transform_13, window_bounds = array<i64: 32, 128>}, {pipeline_mode = #tpu.pipeline_mode<synchronous>, transform_indices = @transform_14, window_bounds = array<i64: 32, 128>}, {pipeline_mode = #tpu.pipeline_mode<synchronous>, transform_indices = @transform_15, window_bounds = array<i64: 32, 128>}, {pipeline_mode = #tpu.pipeline_mode<synchronous>, transform_indices = @transform_16, window_bounds = array<i64: 32, 128>}, {pipeline_mode = #tpu.pipeline_mode<synchronous>, transform_indices = @transform_17, window_bounds = array<i64: 1, 128>}, {transform_indices = @transform_18, window_bounds = array<i64: 2, 128>}]} {
    %c0 = arith.constant 0 : index
    %c0_0 = arith.constant 0 : index
    %0 = vector.load %arg1[%c0, %c0_0] : memref<2x16xf32, #tpu.memory_space<vmem>>, vector<2x16xf32>
    %c0_1 = arith.constant 0 : index
    %c0_2 = arith.constant 0 : index
    %1 = vector.load %arg2[%c0_1, %c0_2] : memref<2x16xf32, #tpu.memory_space<vmem>>, vector<2x16xf32>
    %c0_3 = arith.constant 0 : index
    %c0_4 = arith.constant 0 : index
    %2 = vector.load %arg3[%c0_3, %c0_4] : memref<16x32xf32, #tpu.memory_space<vmem>>, vector<16x32xf32>
    %cst = arith.constant dense<0.000000e+00> : vector<2x32xf32>
    %3 = tpu.matmul %0, %2, %cst {dimension_numbers = #tpu.dot_dimension_numbers<[1], [0], [0], [1], [0, 0, 1, 1], [], []>} : vector<2x16xf32>, vector<16x32xf32>, vector<2x32xf32> -> vector<2x32xf32>
    %c0_5 = arith.constant 0 : index
    %c0_6 = arith.constant 0 : index
    %4 = vector.load %arg4[%c0_5, %c0_6] : memref<1x32xf32, #tpu.memory_space<vmem>>, vector<1x32xf32>
    %5 = vector.broadcast %4 : vector<1x32xf32> to vector<2x32xf32>
    %6 = arith.addf %3, %5 : vector<2x32xf32>
    %cst_7 = arith.constant 0.000000e+00 : f32
    %7 = vector.broadcast %cst_7 : f32 to vector<2x32xf32>
    %8 = arith.maximumf %6, %7 : vector<2x32xf32>
    %c0_8 = arith.constant 0 : index
    %c0_9 = arith.constant 0 : index
    %9 = vector.load %arg5[%c0_8, %c0_9] : memref<16x32xf32, #tpu.memory_space<vmem>>, vector<16x32xf32>
    %cst_10 = arith.constant dense<0.000000e+00> : vector<2x32xf32>
    %10 = tpu.matmul %1, %9, %cst_10 {dimension_numbers = #tpu.dot_dimension_numbers<[1], [0], [0], [1], [0, 0, 1, 1], [], []>} : vector<2x16xf32>, vector<16x32xf32>, vector<2x32xf32> -> vector<2x32xf32>
    %c0_11 = arith.constant 0 : index
    %c0_12 = arith.constant 0 : index
    %11 = vector.load %arg6[%c0_11, %c0_12] : memref<32x32xf32, #tpu.memory_space<vmem>>, vector<32x32xf32>
    %cst_13 = arith.constant dense<0.000000e+00> : vector<2x32xf32>
    %12 = tpu.matmul %8, %11, %cst_13 {dimension_numbers = #tpu.dot_dimension_numbers<[1], [0], [0], [1], [0, 0, 1, 1], [], []>} : vector<2x32xf32>, vector<32x32xf32>, vector<2x32xf32> -> vector<2x32xf32>
    %13 = arith.addf %10, %12 : vector<2x32xf32>
    %c0_14 = arith.constant 0 : index
    %c0_15 = arith.constant 0 : index
    %14 = vector.load %arg7[%c0_14, %c0_15] : memref<1x32xf32, #tpu.memory_space<vmem>>, vector<1x32xf32>
    %15 = vector.broadcast %14 : vector<1x32xf32> to vector<2x32xf32>
    %16 = arith.addf %13, %15 : vector<2x32xf32>
    %cst_16 = arith.constant 0.000000e+00 : f32
    %17 = vector.broadcast %cst_16 : f32 to vector<2x32xf32>
    %18 = arith.maximumf %16, %17 : vector<2x32xf32>
    %c0_17 = arith.constant 0 : index
    %c0_18 = arith.constant 0 : index
    %19 = vector.load %arg8[%c0_17, %c0_18] : memref<16x32xf32, #tpu.memory_space<vmem>>, vector<16x32xf32>
    %cst_19 = arith.constant dense<0.000000e+00> : vector<2x32xf32>
    %20 = tpu.matmul %0, %19, %cst_19 {dimension_numbers = #tpu.dot_dimension_numbers<[1], [0], [0], [1], [0, 0, 1, 1], [], []>} : vector<2x16xf32>, vector<16x32xf32>, vector<2x32xf32> -> vector<2x32xf32>
    %c0_20 = arith.constant 0 : index
    %c0_21 = arith.constant 0 : index
    %21 = vector.load %arg9[%c0_20, %c0_21] : memref<32x32xf32, #tpu.memory_space<vmem>>, vector<32x32xf32>
    %cst_22 = arith.constant dense<0.000000e+00> : vector<2x32xf32>
    %22 = tpu.matmul %18, %21, %cst_22 {dimension_numbers = #tpu.dot_dimension_numbers<[1], [0], [0], [1], [0, 0, 1, 1], [], []>} : vector<2x32xf32>, vector<32x32xf32>, vector<2x32xf32> -> vector<2x32xf32>
    %23 = arith.addf %20, %22 : vector<2x32xf32>
    %c0_23 = arith.constant 0 : index
    %c0_24 = arith.constant 0 : index
    %24 = vector.load %arg10[%c0_23, %c0_24] : memref<1x32xf32, #tpu.memory_space<vmem>>, vector<1x32xf32>
    %25 = vector.broadcast %24 : vector<1x32xf32> to vector<2x32xf32>
    %26 = arith.addf %23, %25 : vector<2x32xf32>
    %cst_25 = arith.constant 0.000000e+00 : f32
    %27 = vector.broadcast %cst_25 : f32 to vector<2x32xf32>
    %28 = arith.maximumf %26, %27 : vector<2x32xf32>
    %c0_26 = arith.constant 0 : index
    %c0_27 = arith.constant 0 : index
    %29 = vector.load %arg11[%c0_26, %c0_27] : memref<16x32xf32, #tpu.memory_space<vmem>>, vector<16x32xf32>
    %cst_28 = arith.constant dense<0.000000e+00> : vector<2x32xf32>
    %30 = tpu.matmul %1, %29, %cst_28 {dimension_numbers = #tpu.dot_dimension_numbers<[1], [0], [0], [1], [0, 0, 1, 1], [], []>} : vector<2x16xf32>, vector<16x32xf32>, vector<2x32xf32> -> vector<2x32xf32>
    %c0_29 = arith.constant 0 : index
    %c0_30 = arith.constant 0 : index
    %31 = vector.load %arg12[%c0_29, %c0_30] : memref<32x32xf32, #tpu.memory_space<vmem>>, vector<32x32xf32>
    %cst_31 = arith.constant dense<0.000000e+00> : vector<2x32xf32>
    %32 = tpu.matmul %28, %31, %cst_31 {dimension_numbers = #tpu.dot_dimension_numbers<[1], [0], [0], [1], [0, 0, 1, 1], [], []>} : vector<2x32xf32>, vector<32x32xf32>, vector<2x32xf32> -> vector<2x32xf32>
    %33 = arith.addf %30, %32 : vector<2x32xf32>
    %c0_32 = arith.constant 0 : index
    %c0_33 = arith.constant 0 : index
    %34 = vector.load %arg13[%c0_32, %c0_33] : memref<1x32xf32, #tpu.memory_space<vmem>>, vector<1x32xf32>
    %35 = vector.broadcast %34 : vector<1x32xf32> to vector<2x32xf32>
    %36 = arith.addf %33, %35 : vector<2x32xf32>
    %cst_34 = arith.constant 0.000000e+00 : f32
    %37 = vector.broadcast %cst_34 : f32 to vector<2x32xf32>
    %38 = arith.maximumf %36, %37 : vector<2x32xf32>
    %c0_35 = arith.constant 0 : index
    %c0_36 = arith.constant 0 : index
    %39 = vector.load %arg14[%c0_35, %c0_36] : memref<32x128xf32, #tpu.memory_space<vmem>>, vector<32x128xf32>
    %cst_37 = arith.constant dense<0.000000e+00> : vector<2x128xf32>
    %40 = tpu.matmul %8, %39, %cst_37 {dimension_numbers = #tpu.dot_dimension_numbers<[1], [0], [0], [1], [0, 0, 1, 1], [], []>} : vector<2x32xf32>, vector<32x128xf32>, vector<2x128xf32> -> vector<2x128xf32>
    %c0_38 = arith.constant 0 : index
    %c0_39 = arith.constant 0 : index
    %41 = vector.load %arg15[%c0_38, %c0_39] : memref<32x128xf32, #tpu.memory_space<vmem>>, vector<32x128xf32>
    %cst_40 = arith.constant dense<0.000000e+00> : vector<2x128xf32>
    %42 = tpu.matmul %18, %41, %cst_40 {dimension_numbers = #tpu.dot_dimension_numbers<[1], [0], [0], [1], [0, 0, 1, 1], [], []>} : vector<2x32xf32>, vector<32x128xf32>, vector<2x128xf32> -> vector<2x128xf32>
    %43 = arith.addf %40, %42 : vector<2x128xf32>
    %c0_41 = arith.constant 0 : index
    %c0_42 = arith.constant 0 : index
    %44 = vector.load %arg16[%c0_41, %c0_42] : memref<32x128xf32, #tpu.memory_space<vmem>>, vector<32x128xf32>
    %cst_43 = arith.constant dense<0.000000e+00> : vector<2x128xf32>
    %45 = tpu.matmul %28, %44, %cst_43 {dimension_numbers = #tpu.dot_dimension_numbers<[1], [0], [0], [1], [0, 0, 1, 1], [], []>} : vector<2x32xf32>, vector<32x128xf32>, vector<2x128xf32> -> vector<2x128xf32>
    %46 = arith.addf %43, %45 : vector<2x128xf32>
    %c0_44 = arith.constant 0 : index
    %c0_45 = arith.constant 0 : index
    %47 = vector.load %arg17[%c0_44, %c0_45] : memref<32x128xf32, #tpu.memory_space<vmem>>, vector<32x128xf32>
    %cst_46 = arith.constant dense<0.000000e+00> : vector<2x128xf32>
    %48 = tpu.matmul %38, %47, %cst_46 {dimension_numbers = #tpu.dot_dimension_numbers<[1], [0], [0], [1], [0, 0, 1, 1], [], []>} : vector<2x32xf32>, vector<32x128xf32>, vector<2x128xf32> -> vector<2x128xf32>
    %49 = arith.addf %46, %48 : vector<2x128xf32>
    %c0_47 = arith.constant 0 : index
    %c0_48 = arith.constant 0 : index
    %50 = vector.load %arg18[%c0_47, %c0_48] : memref<1x128xf32, #tpu.memory_space<vmem>>, vector<1x128xf32>
    %51 = vector.broadcast %50 : vector<1x128xf32> to vector<2x128xf32>
    %52 = arith.addf %49, %51 : vector<2x128xf32>
    %53 = tpu.iota {dimensions = array<i32: 1>} : vector<2x128xi32>
    %c2_i32 = arith.constant 2 : i32
    %54 = vector.broadcast %c2_i32 : i32 to vector<2x128xi32>
    %55 = arith.cmpi slt, %53, %54 : vector<2x128xi32>
    %cst_49 = arith.constant -1.000000e+30 : f32
    %56 = vector.broadcast %cst_49 : f32 to vector<2x128xf32>
    %57 = arith.select %55, %52, %56 : vector<2x128xi1>, vector<2x128xf32>
    %cst_50 = arith.constant dense<0xFF800000> : vector<2xf32>
    %58 = vector.multi_reduction <maximumf>, %57, %cst_50 [1] : vector<2x128xf32> to vector<2xf32>
    %59 = vector.shape_cast %58 : vector<2xf32> to vector<2x1xf32>
    %60 = vector.broadcast %59 : vector<2x1xf32> to vector<2x128xf32>
    %61 = arith.subf %57, %60 : vector<2x128xf32>
    %62 = math.exp %61 : vector<2x128xf32>
    %cst_51 = arith.constant dense<0.000000e+00> : vector<2xf32>
    %63 = vector.multi_reduction <add>, %62, %cst_51 [1] : vector<2x128xf32> to vector<2xf32>
    %64 = vector.shape_cast %63 : vector<2xf32> to vector<2x1xf32>
    %65 = tpu.reciprocal %64 {approx = true} : vector<2x1xf32> -> vector<2x1xf32>
    %66 = vector.broadcast %65 : vector<2x1xf32> to vector<2x128xf32>
    %67 = arith.mulf %62, %66 : vector<2x128xf32>
    %c0_52 = arith.constant 0 : index
    %c0_53 = arith.constant 0 : index
    %68 = vector.load %arg19[%c0_52, %c0_53] : memref<2x128xf32, #tpu.memory_space<vmem>>, vector<2x128xf32>
    tpu.vector_store %arg19[%c0_52, %c0_53], %67 {strides = array<i32>} : memref<2x128xf32, #tpu.memory_space<vmem>>, vector<2x128xf32>,
    return
  }
  func.func @transform_0(%arg0: i32) -> (i32, i32) {
    %c0_i32 = arith.constant 0 : i32
    %c0_i32_0 = arith.constant 0 : i32
    return %arg0, %c0_i32 : i32, i32
  }
  func.func @transform_1(%arg0: i32) -> (i32, i32) {
    %c0_i32 = arith.constant 0 : i32
    %c0_i32_0 = arith.constant 0 : i32
    return %arg0, %c0_i32 : i32, i32
  }
  func.func @transform_2(%arg0: i32) -> (i32, i32) {
    %c0_i32 = arith.constant 0 : i32
    %c0_i32_0 = arith.constant 0 : i32
    %c0_i32_1 = arith.constant 0 : i32
    return %c0_i32, %c0_i32_0 : i32, i32
  }
  func.func @transform_3(%arg0: i32) -> (i32, i32) {
    %c0_i32 = arith.constant 0 : i32
    %c0_i32_0 = arith.constant 0 : i32
    %c0_i32_1 = arith.constant 0 : i32
    return %c0_i32, %c0_i32_0 : i32, i32
  }
  func.func @transform_4(%arg0: i32) -> (i32, i32) {
    %c0_i32 = arith.constant 0 : i32
    %c0_i32_0 = arith.constant 0 : i32
    %c0_i32_1 = arith.constant 0 : i32
    return %c0_i32, %c0_i32_0 : i32, i32
  }
  func.func @transform_5(%arg0: i32) -> (i32, i32) {
    %c0_i32 = arith.constant 0 : i32
    %c0_i32_0 = arith.constant 0 : i32
    %c0_i32_1 = arith.constant 0 : i32
    return %c0_i32, %c0_i32_0 : i32, i32
  }
  func.func @transform_6(%arg0: i32) -> (i32, i32) {
    %c0_i32 = arith.constant 0 : i32
    %c0_i32_0 = arith.constant 0 : i32
    %c0_i32_1 = arith.constant 0 : i32
    return %c0_i32, %c0_i32_0 : i32, i32
  }
  func.func @transform_7(%arg0: i32) -> (i32, i32) {
    %c0_i32 = arith.constant 0 : i32
    %c0_i32_0 = arith.constant 0 : i32
    %c0_i32_1 = arith.constant 0 : i32
    return %c0_i32, %c0_i32_0 : i32, i32
  }
  func.func @transform_8(%arg0: i32) -> (i32, i32) {
    %c0_i32 = arith.constant 0 : i32
    %c0_i32_0 = arith.constant 0 : i32
    %c0_i32_1 = arith.constant 0 : i32
    return %c0_i32, %c0_i32_0 : i32, i32
  }
  func.func @transform_9(%arg0: i32) -> (i32, i32) {
    %c0_i32 = arith.constant 0 : i32
    %c0_i32_0 = arith.constant 0 : i32
    %c0_i32_1 = arith.constant 0 : i32
    return %c0_i32, %c0_i32_0 : i32, i32
  }
  func.func @transform_10(%arg0: i32) -> (i32, i32) {
    %c0_i32 = arith.constant 0 : i32
    %c0_i32_0 = arith.constant 0 : i32
    %c0_i32_1 = arith.constant 0 : i32
    return %c0_i32, %c0_i32_0 : i32, i32
  }
  func.func @transform_11(%arg0: i32) -> (i32, i32) {
    %c0_i32 = arith.constant 0 : i32
    %c0_i32_0 = arith.constant 0 : i32
    %c0_i32_1 = arith.constant 0 : i32
    return %c0_i32, %c0_i32_0 : i32, i32
  }
  func.func @transform_12(%arg0: i32) -> (i32, i32) {
    %c0_i32 = arith.constant 0 : i32
    %c0_i32_0 = arith.constant 0 : i32
    %c0_i32_1 = arith.constant 0 : i32
    return %c0_i32, %c0_i32_0 : i32, i32
  }
  func.func @transform_13(%arg0: i32) -> (i32, i32) {
    %c0_i32 = arith.constant 0 : i32
    %c0_i32_0 = arith.constant 0 : i32
    %c0_i32_1 = arith.constant 0 : i32
    return %c0_i32, %c0_i32_0 : i32, i32
  }
  func.func @transform_14(%arg0: i32) -> (i32, i32) {
    %c0_i32 = arith.constant 0 : i32
    %c0_i32_0 = arith.constant 0 : i32
    %c0_i32_1 = arith.constant 0 : i32
    return %c0_i32, %c0_i32_0 : i32, i32
  }
  func.func @transform_15(%arg0: i32) -> (i32, i32) {
    %c0_i32 = arith.constant 0 : i32
    %c0_i32_0 = arith.constant 0 : i32
    %c0_i32_1 = arith.constant 0 : i32
    return %c0_i32, %c0_i32_0 : i32, i32
  }
  func.func @transform_16(%arg0: i32) -> (i32, i32) {
    %c0_i32 = arith.constant 0 : i32
    %c0_i32_0 = arith.constant 0 : i32
    %c0_i32_1 = arith.constant 0 : i32
    return %c0_i32, %c0_i32_0 : i32, i32
  }
  func.func @transform_17(%arg0: i32) -> (i32, i32) {
    %c0_i32 = arith.constant 0 : i32
    %c0_i32_0 = arith.constant 0 : i32
    %c0_i32_1 = arith.constant 0 : i32
    return %c0_i32, %c0_i32_0 : i32, i32
  }
  func.func @transform_18(%arg0: i32) -> (i32, i32) {
    %c0_i32 = arith.constant 0 : i32
    %c0_i32_0 = arith.constant 0 : i32
    return %arg0, %c0_i32 : i32, i32
  }
}

</mosaic_0001>

<bundles_post_ra>
// kernel: tpu_custom_call.1
= control target key start
LH: loop header
LB: loop body
LE: loop exit
PB: predicated region body
PF: predicated region fallthrough
CT: control target
= control target key end

     0   :  { %s2012_s0 = inlined_call_operand.hbm [shape: f32[2,16], index: 0, kind: input, shape index: {}]   ;;  %s2013_s1 = inlined_call_operand.vmem [shape: f32[2,16], index: 1, kind: input, shape index: {}]   ;;  %s2014_s2 = inlined_call_operand.hbm [shape: f32[16,32], index: 2, kind: input, shape index: {}]   ;;  %s2015_s3 = inlined_call_operand.vmem [shape: f32[1,32], index: 3, kind: input, shape index: {}]   ;;  %s2016_s4 = inlined_call_operand.hbm [shape: f32[16,32], index: 4, kind: input, shape index: {}]   ;;  %s2017_s5 = inlined_call_operand.hbm [shape: f32[32,32], index: 5, kind: input, shape index: {}]   ;;  %s2018_s6 = inlined_call_operand.vmem [shape: f32[1,32], index: 6, kind: input, shape index: {}]   ;;  %s2019_s7 = inlined_call_operand.hbm [shape: f32[16,32], index: 7, kind: input, shape index: {}]   ;;  %s2020_s8 = inlined_call_operand.hbm [shape: f32[32,32], index: 8, kind: input, shape index: {}]   ;;  %s2021_s9 = inlined_call_operand.vmem [shape: f32[1,32], index: 9, kind: input, shape index: {}]   ;;  %s2022_s10 = inlined_call_operand.hbm [shape: f32[16,32], index: 10, kind: input, shape index: {}]   ;;  %s2023_s11 = inlined_call_operand.vmem [shape: f32[32,32], index: 11, kind: input, shape index: {}]   ;;  %s2024_s12 = inlined_call_operand.vmem [shape: f32[1,32], index: 12, kind: input, shape index: {}]   ;;  %s2025_s13 = inlined_call_operand.hbm [shape: f32[32,128], index: 13, kind: input, shape index: {}]   ;;  %s2026_s14 = inlined_call_operand.hbm [shape: f32[32,128], index: 14, kind: input, shape index: {}]   ;;  %s2027_s15 = inlined_call_operand.hbm [shape: f32[32,128], index: 15, kind: input, shape index: {}]   ;;  %s2028_s16 = inlined_call_operand.hbm [shape: f32[32,128], index: 16, kind: input, shape index: {}]   ;;  %s2029_s17 = inlined_call_operand.vmem [shape: f32[1,128], index: 17, kind: input, shape index: {}]   ;;  %s2030_s18 = inlined_call_operand.hbm [shape: f32[2,128], index: 18, kind: output, shape index: {}]  }
   0x1   :  { %2034 = sst [smem:[#allocation28_spill]] %s2012_s0 }
   0x2   :  { %2035 = sst [smem:[#allocation29_spill]] %s2013_s1 }
   0x3   :  { %2036 = sst [smem:[#allocation30_spill]] %s2014_s2 }
   0x4   :  { %2037 = sst [smem:[#allocation31_spill]] %s2029_s17 }
   0x5   :  { %2038 = sst [smem:[#allocation32_spill]] %s2030_s18 }
   0x6   :  { %23 = vsyncpa [#allocation3], 0 }
   0x7   :  { %24 = vsyncpa [#allocation6], 0 }
   0x8   :  { %25 = vsyncpa [#allocation9], 0 }
   0x9   :  { %26 = vsyncpa [#allocation12], 0 }
   0xa   :  { %27 = vsyncpa [#allocation15], 0 }
   0xb   :  { %28 = vsyncpa [#allocation18], 0 }
   0xc   :  { %29 = vsyncpa [#allocation4], 0  ;;  %s1638_s27 = smov [#allocation5]   ;;  %s2039_s0 = sld [smem:[#allocation30_spill]] }
   0xd   :  { %s47_s28 = sshll.u32 %s1638_s27, 4  ;;  %s48_s28 = int_to_ptr.vmem [resolvable:$true] %s47_s28 }
  0x12   :  { %s1360_s19 = scalar_lea.hbm %s2039_s0, 256 }
  0x13   :  { %p1361_p0 = scmp.ne.s32.totalorder %s2039_s0, %s1360_s19  ;;  %p1364_p1 = scmp.lt.u32.totalorder %s1360_s19, %s2039_s0 }
  0x15   :  { %p1366_p2 = pnand %p1364_p1, %p1361_p0 }
  0x17   :  { %1369 = shalt.err (!%p1366_p2)
}
  0x18   :  { %s1370_s2 = scalar_lea.vmem %s48_s28, 256  ;;  %p1375_p4 = scmp.lt.s32.totalorder %s48_s28, %s48_s28 }
  0x19   :  { %p1371_p3 = scmp.ne.s32.totalorder %s48_s28, %s1370_s2  ;;  %p1376_p5 = scmp.lt.s32.totalorder %s1370_s2, %s1370_s2 }
  0x1b   :  { %p1377_p6 = por %p1376_p5, %p1375_p4 }
  0x1d   :  { %p1378_p7 = pnand %p1377_p6, %p1371_p3 }
  0x1f   :  { %1381 = shalt.err (!%p1378_p7)
}
  0x20   :  { %s1639_s23 = smov 128   ;;  %s1640_s24 = smov 8  }
  0x21   :  { %53 = dma.hbm_to_vmem [thread:$0]  %s2039_s0, 256, %s48_s28, [#allocation6], %s1639_s23, %s1639_s23, %s1640_s24  }
  0x22   :  { %s1641_s27 = smov [#allocation8]   ;;  %s1642_s30 = smov [#allocation11]  }
  0x23   :  { %s73_s29 = sshll.u32 %s1641_s27, 4  ;;  %s99_s19 = sshll.u32 %s1642_s30, 4  ;;  %s74_s29 = int_to_ptr.vmem [resolvable:$true] %s73_s29  ;;  %s100_s19 = int_to_ptr.vmem [resolvable:$true] %s99_s19 }
  0x24   :  { %s1382_s21 = scalar_lea.hbm %s2017_s5, 512 }
  0x25   :  { %p1383_p8 = scmp.ne.s32.totalorder %s2017_s5, %s1382_s21  ;;  %p1386_p9 = scmp.lt.u32.totalorder %s1382_s21, %s2017_s5 }
  0x27   :  { %p1388_p10 = pnand %p1386_p9, %p1383_p8 }
  0x29   :  { %1391 = shalt.err (!%p1388_p10)
}
  0x2a   :  { %s1392_s28 = scalar_lea.vmem %s74_s29, 512  ;;  %p1397_p12 = scmp.lt.s32.totalorder %s74_s29, %s74_s29 }
  0x2b   :  { %p1393_p11 = scmp.ne.s32.totalorder %s74_s29, %s1392_s28  ;;  %p1398_p13 = scmp.lt.s32.totalorder %s1392_s28, %s1392_s28 }
  0x2d   :  { %p1399_p0 = por %p1398_p13, %p1397_p12 }
  0x2f   :  { %p1400_p1 = pnand %p1399_p0, %p1393_p11 }
  0x31   :  { %1403 = shalt.err (!%p1400_p1)
}
  0x32   :  { %79 = dma.hbm_to_vmem [thread:$0]  %s2017_s5, 512, %s74_s29, [#allocation9], %s1639_s23, %s1639_s23, %s1640_s24  }
  0x33   :  { %s1404_s18 = scalar_lea.hbm %s2020_s8, 512 }
  0x34   :  { %p1405_p2 = scmp.ne.s32.totalorder %s2020_s8, %s1404_s18  ;;  %p1408_p3 = scmp.lt.u32.totalorder %s1404_s18, %s2020_s8 }
  0x36   :  { %p1410_p4 = pnand %p1408_p3, %p1405_p2 }
  0x38   :  { %1413 = shalt.err (!%p1410_p4)
}
  0x39   :  { %s1414_s21 = scalar_lea.vmem %s100_s19, 512  ;;  %p1419_p6 = scmp.lt.s32.totalorder %s100_s19, %s100_s19 }
  0x3a   :  { %p1415_p5 = scmp.ne.s32.totalorder %s100_s19, %s1414_s21  ;;  %p1420_p7 = scmp.lt.s32.totalorder %s1414_s21, %s1414_s21 }
  0x3c   :  { %p1421_p8 = por %p1420_p7, %p1419_p6 }
  0x3e   :  { %p1422_p9 = pnand %p1421_p8, %p1415_p5 }
  0x40   :  { %1425 = shalt.err (!%p1422_p9)
}
  0x41   :  { %105 = dma.hbm_to_vmem [thread:$0]  %s2020_s8, 512, %s100_s19, [#allocation12], %s1639_s23, %s1639_s23, %s1640_s24  }
  0x42   :  { %s1643_s22 = smov [#allocation14]   ;;  %s1644_s28 = smov [#allocation17]  }
  0x43   :  { %s129_s2 = sshll.u32 %s1643_s22, 4  ;;  %s153_s0 = sshll.u32 %s1644_s28, 4  ;;  %s130_s2 = int_to_ptr.vmem [resolvable:$true] %s129_s2  ;;  %s154_s0 = int_to_ptr.vmem [resolvable:$true] %s153_s0 }
  0x44   :  { %s1426_s17 = scalar_lea.hbm %s2025_s13, 512 }
  0x45   :  { %p1427_p10 = scmp.ne.s32.totalorder %s2025_s13, %s1426_s17  ;;  %p1430_p11 = scmp.lt.u32.totalorder %s1426_s17, %s2025_s13 }
  0x47   :  { %p1432_p12 = pnand %p1430_p11, %p1427_p10 }
  0x49   :  { %1435 = shalt.err (!%p1432_p12)
}
  0x4a   :  { %s1436_s8 = scalar_lea.vmem %s130_s2, 512  ;;  %p1441_p0 = scmp.lt.s32.totalorder %s130_s2, %s130_s2 }
  0x4b   :  { %p1437_p13 = scmp.ne.s32.totalorder %s130_s2, %s1436_s8  ;;  %p1442_p1 = scmp.lt.s32.totalorder %s1436_s8, %s1436_s8 }
  0x4d   :  { %p1443_p2 = por %p1442_p1, %p1441_p0 }
  0x4f   :  { %p1444_p3 = pnand %p1443_p2, %p1437_p13 }
  0x51   :  { %1447 = shalt.err (!%p1444_p3)
}
  0x52   :  { %135 = dma.hbm_to_vmem [thread:$0]  %s2025_s13, 512, %s130_s2, [#allocation15], %s1639_s23, %s1639_s23, %s1640_s24  }
  0x53   :  { %s1448_s29 = scalar_lea.hbm %s2027_s15, 512 }
  0x54   :  { %p1449_p4 = scmp.ne.s32.totalorder %s2027_s15, %s1448_s29  ;;  %p1452_p5 = scmp.lt.u32.totalorder %s1448_s29, %s2027_s15 }
  0x56   :  { %p1454_p6 = pnand %p1452_p5, %p1449_p4 }
  0x58   :  { %1457 = shalt.err (!%p1454_p6)
}
  0x59   :  { %s1458_s17 = scalar_lea.vmem %s154_s0, 512  ;;  %p1463_p8 = scmp.lt.s32.totalorder %s154_s0, %s154_s0 }
  0x5a   :  { %p1459_p7 = scmp.ne.s32.totalorder %s154_s0, %s1458_s17  ;;  %p1464_p9 = scmp.lt.s32.totalorder %s1458_s17, %s1458_s17 }
  0x5c   :  { %p1465_p10 = por %p1464_p9, %p1463_p8 }
  0x5e   :  { %p1466_p11 = pnand %p1465_p10, %p1459_p7 }
  0x60   :  { %1469 = shalt.err (!%p1466_p11)
}
  0x61   :  { %159 = dma.hbm_to_vmem [thread:$0]  %s2027_s15, 512, %s154_s0, [#allocation18], %s1639_s23, %s1639_s23, %s1640_s24  }
  0x62   :  { %s1645_s18 = smov [#allocation2]   ;;  %s1646_s30 = smov [#allocation7]  }
  0x63   :  { %s36_s27 = sshll.u32 %s1645_s18, 4  ;;  %s61_s1 = sshll.u32 %s1646_s30, 4  ;;  %s37_s27 = int_to_ptr.vmem [resolvable:$true] %s36_s27  ;;  %s62_s1 = int_to_ptr.vmem [resolvable:$true] %s61_s1 }
  0x64   :  { %s2040_s20 = sld [smem:[#allocation28_spill]] }
  0x6a   :  { %s1470_s21 = scalar_lea.hbm %s2040_s20, 32 }
  0x6b   :  { %p1471_p12 = scmp.ne.s32.totalorder %s2040_s20, %s1470_s21  ;;  %p1474_p13 = scmp.lt.u32.totalorder %s1470_s21, %s2040_s20 }
  0x6d   :  { %p1476_p0 = pnand %p1474_p13, %p1471_p12 }
  0x6f   :  { %1479 = shalt.err (!%p1476_p0)
}
  0x70   :  { %s1480_s15 = scalar_lea.vmem %s37_s27, 32  ;;  %p1485_p2 = scmp.lt.s32.totalorder %s37_s27, %s37_s27 }
  0x71   :  { %p1481_p1 = scmp.ne.s32.totalorder %s37_s27, %s1480_s15  ;;  %p1486_p3 = scmp.lt.s32.totalorder %s1480_s15, %s1480_s15 }
  0x73   :  { %p1487_p4 = por %p1486_p3, %p1485_p2 }
  0x75   :  { %p1488_p5 = pnand %p1487_p4, %p1481_p1 }
  0x77   :  { %1491 = shalt.err (!%p1488_p5)
}
  0x78   :  { %39 = dma.hbm_to_vmem [thread:$0]  %s2040_s20, 32, %s37_s27, [#allocation3]  }
  0x79   :  { %s1492_s13 = scalar_lea.hbm %s2016_s4, 256 }
  0x7a   :  { %p1493_p6 = scmp.ne.s32.totalorder %s2016_s4, %s1492_s13  ;;  %p1496_p7 = scmp.lt.u32.totalorder %s1492_s13, %s2016_s4 }
  0x7c   :  { %p1498_p8 = pnand %p1496_p7, %p1493_p6 }
  0x7e   :  { %1501 = shalt.err (!%p1498_p8)
}
  0x7f   :  { %s1502_s19 = scalar_lea.vmem %s62_s1, 256  ;;  %p1507_p10 = scmp.lt.s32.totalorder %s62_s1, %s62_s1 }
  0x80   :  { %p1503_p9 = scmp.ne.s32.totalorder %s62_s1, %s1502_s19  ;;  %p1508_p11 = scmp.lt.s32.totalorder %s1502_s19, %s1502_s19 }
  0x82   :  { %p1509_p12 = por %p1508_p11, %p1507_p10 }
  0x84   :  { %p1510_p13 = pnand %p1509_p12, %p1503_p9 }
  0x86   :  { %1513 = shalt.err (!%p1510_p13)
}
  0x87   :  { %67 = dma.hbm_to_vmem [thread:$0]  %s2016_s4, 256, %s62_s1, [#allocation6], %s1639_s23, %s1639_s23, %s1640_s24  }
  0x88   :  { %s1647_s21 = smov [#allocation10]   ;;  %s1648_s29 = smov [#allocation13]  }
  0x89   :  { %s87_s5 = sshll.u32 %s1647_s21, 4  ;;  %s113_s22 = sshll.u32 %s1648_s29, 4  ;;  %s88_s5 = int_to_ptr.vmem [resolvable:$true] %s87_s5  ;;  %s114_s22 = int_to_ptr.vmem [resolvable:$true] %s113_s22 }
  0x8a   :  { %s1514_s0 = scalar_lea.hbm %s2019_s7, 256 }
  0x8b   :  { %p1515_p0 = scmp.ne.s32.totalorder %s2019_s7, %s1514_s0  ;;  %p1518_p1 = scmp.lt.u32.totalorder %s1514_s0, %s2019_s7 }
  0x8d   :  { %p1520_p2 = pnand %p1518_p1, %p1515_p0 }
  0x8f   :  { %1523 = shalt.err (!%p1520_p2)
}
  0x90   :  { %s1524_s4 = scalar_lea.vmem %s88_s5, 256  ;;  %p1529_p4 = scmp.lt.s32.totalorder %s88_s5, %s88_s5 }
  0x91   :  { %p1525_p3 = scmp.ne.s32.totalorder %s88_s5, %s1524_s4  ;;  %p1530_p5 = scmp.lt.s32.totalorder %s1524_s4, %s1524_s4 }
  0x93   :  { %p1531_p6 = por %p1530_p5, %p1529_p4 }
  0x95   :  { %p1532_p7 = pnand %p1531_p6, %p1525_p3 }
  0x97   :  { %1535 = shalt.err (!%p1532_p7)
}
  0x98   :  { %93 = dma.hbm_to_vmem [thread:$0]  %s2019_s7, 256, %s88_s5, [#allocation9], %s1639_s23, %s1639_s23, %s1640_s24  }
  0x99   :  { %s1536_s8 = scalar_lea.hbm %s2022_s10, 256 }
  0x9a   :  { %p1537_p8 = scmp.ne.s32.totalorder %s2022_s10, %s1536_s8  ;;  %p1540_p9 = scmp.lt.u32.totalorder %s1536_s8, %s2022_s10 }
  0x9c   :  { %p1542_p10 = pnand %p1540_p9, %p1537_p8 }
  0x9e   :  { %1545 = shalt.err (!%p1542_p10)
}
  0x9f   :  { %s1546_s29 = scalar_lea.vmem %s114_s22, 256  ;;  %p1551_p12 = scmp.lt.s32.totalorder %s114_s22, %s114_s22 }
  0xa0   :  { %p1547_p11 = scmp.ne.s32.totalorder %s114_s22, %s1546_s29  ;;  %p1552_p13 = scmp.lt.s32.totalorder %s1546_s29, %s1546_s29 }
  0xa2   :  { %p1553_p0 = por %p1552_p13, %p1551_p12 }
  0xa4   :  { %p1554_p1 = pnand %p1553_p0, %p1547_p11 }
  0xa6   :  { %1557 = shalt.err (!%p1554_p1)
}
  0xa7   :  { %119 = dma.hbm_to_vmem [thread:$0]  %s2022_s10, 256, %s114_s22, [#allocation12], %s1639_s23, %s1639_s23, %s1640_s24  }
  0xa8   :  { %s1649_s28 = smov [#allocation16]   ;;  %s1650_s0 = smov [#allocation19]  }
  0xa9   :  { %s141_s15 = sshll.u32 %s1649_s28, 4  ;;  %s165_s25 = sshll.u32 %s1650_s0, 4  ;;  %s142_s15 = int_to_ptr.vmem [resolvable:$true] %s141_s15  ;;  %s166_s25 = int_to_ptr.vmem [resolvable:$true] %s165_s25 }
  0xaa   :  { %s1558_s13 = scalar_lea.hbm %s2026_s14, 512 }
  0xab   :  { %p1559_p2 = scmp.ne.s32.totalorder %s2026_s14, %s1558_s13  ;;  %p1562_p3 = scmp.lt.u32.totalorder %s1558_s13, %s2026_s14 }
  0xad   :  { %p1564_p4 = pnand %p1562_p3, %p1559_p2 }
  0xaf   :  { %1567 = shalt.err (!%p1564_p4)
}
  0xb0   :  { %s1568_s10 = scalar_lea.vmem %s142_s15, 512  ;;  %p1573_p6 = scmp.lt.s32.totalorder %s142_s15, %s142_s15 }
  0xb1   :  { %p1569_p5 = scmp.ne.s32.totalorder %s142_s15, %s1568_s10  ;;  %p1574_p7 = scmp.lt.s32.totalorder %s1568_s10, %s1568_s10 }
  0xb3   :  { %p1575_p8 = por %p1574_p7, %p1573_p6 }
  0xb5   :  { %p1576_p9 = pnand %p1575_p8, %p1569_p5 }
  0xb7   :  { %1579 = shalt.err (!%p1576_p9)
}
  0xb8   :  { %147 = dma.hbm_to_vmem [thread:$0]  %s2026_s14, 512, %s142_s15, [#allocation15], %s1639_s23, %s1639_s23, %s1640_s24  }
  0xb9   :  { %s1580_s27 = scalar_lea.hbm %s2028_s16, 512 }
  0xba   :  { %p1581_p10 = scmp.ne.s32.totalorder %s2028_s16, %s1580_s27  ;;  %p1584_p11 = scmp.lt.u32.totalorder %s1580_s27, %s2028_s16 }
  0xbc   :  { %p1586_p12 = pnand %p1584_p11, %p1581_p10 }
  0xbe   :  { %1589 = shalt.err (!%p1586_p12)
}
  0xbf   :  { %s1590_s5 = scalar_lea.vmem %s166_s25, 512  ;;  %p1595_p0 = scmp.lt.s32.totalorder %s166_s25, %s166_s25 }
  0xc0   :  { %p1591_p13 = scmp.ne.s32.totalorder %s166_s25, %s1590_s5  ;;  %p1596_p1 = scmp.lt.s32.totalorder %s1590_s5, %s1590_s5 }
  0xc2   :  { %p1597_p2 = por %p1596_p1, %p1595_p0 }
  0xc4   :  { %p1598_p3 = pnand %p1597_p2, %p1591_p13 }
  0xc6   :  { %1601 = shalt.err (!%p1598_p3)
}
  0xc7   :  { %171 = dma.hbm_to_vmem [thread:$0]  %s2028_s16, 512, %s166_s25, [#allocation18], %s1639_s23, %s1639_s23, %s1640_s24  }
  0xc8   :  { %1624 = dma.done.wait [#allocation3], 32  }
  0xc9   :  { %1625 = vsyncadd [#allocation3], 4294967264 }
  0xca   :  { %1626 = dma.done.wait [#allocation6], 512  }
  0xcb   :  { %1627 = vsyncadd [#allocation6], 4294966784 }
  0xcc   :  { %1628 = dma.done.wait [#allocation9], 768  }
  0xcd   :  { %1629 = vsyncadd [#allocation9], 4294966528 }
  0xce   :  { %1630 = dma.done.wait [#allocation12], 768  }
  0xcf   :  { %1631 = vsyncadd [#allocation12], 4294966528 }
  0xd0   :  { %1632 = dma.done.wait [#allocation15], 1024  }
  0xd1   :  { %1633 = vsyncadd [#allocation15], 4294966272 }
  0xd2   :  { %1634 = dma.done.wait [#allocation18], 1024  }
  0xd3   :  { %1635 = vsyncadd [#allocation18], 4294966272  ;;  %v1651_v0 = vmov 0.0|0.0   ;;  %vm1652_vm0 = vmmov 0   ;;  %v1653_v1 = vmov 0.0   ;;  %v209_v2 = vld [vmem:[#allocation5] sm:$0xff] }
  0xd4   :  { %1285 = vmatprep.subr.bf16.mxu0 %v1651_v0  ;;  %1184 = vmatprep.mubr.msk.f32.mxu0 %vm1652_vm0, %v1653_v1  ;;  %v210_v3 = vld [vmem:[#allocation5 + $0x8] sm:$0xff]  ;;  %v295_v5 = vld [vmem:[#allocation8] sm:$0xff]  ;;  %v207_v8 = vld [vmem:[#allocation2] sm:$0x3]  ;;  %vm218_vm1 = vcmask 130048   ;;  %s2041_s24 = sld [smem:[#allocation29_spill]] }
  0xd5   :  { %1288 = vmatprep.subr.bf16.mxu1 %v1651_v0  ;;  %1195 = vmatprep.mubr.msk.f32.mxu1 %vm1652_vm0, %v1653_v1  ;;  %v1286_v4 = vpack.c.bf16 %v210_v3, %v209_v2  ;;  %v296_v6 = vld [vmem:[#allocation8 + $0x8] sm:$0xff]  ;;  %v293_v9 = vld [vmem:[#allocation7] sm:$0xff]  ;;  %v294_v10 = vld [vmem:[#allocation7 + $0x8] sm:$0xff]  ;;  %vm299_vm2 = vcmask 261120   ;;  %s2042_s19 = sld [smem:[#allocation31_spill]]  ;;  %vm1084_vm4 = vcmask 1041408  }
  0xd6   :  { %v1289_v7 = vpack.c.bf16 %v296_v6, %v295_v5  ;;  %v1295_v11 = vpack.c.bf16 %v294_v10, %v293_v9  ;;  %v297_v12 = vld [vmem:[#allocation8 + $0x10] sm:$0xff]  ;;  %v298_v13 = vld [vmem:[#allocation8 + $0x18] sm:$0xff]  ;;  %v459_v26 = vld [vmem:[#allocation11 + $0x10] sm:$0xff] }
  0xd7   :  { %1287 = vmatpush3.bf16.msra.mxu0 %v1286_v4  ;;  %v1292_v14 = vpack.c.bf16 %v298_v13, %v297_v12  ;;  %v457_v16 = vld [vmem:[#allocation11] sm:$0xff]  ;;  %v458_v17 = vld [vmem:[#allocation11 + $0x8] sm:$0xff]  ;;  %v460_v27 = vld [vmem:[#allocation11 + $0x18] sm:$0xff] }
  0xd8   :  { %1290 = vmatpush3.bf16.msra.mxu1 %v1289_v7  ;;  %1294 = vmatprep.subr.bf16.mxu0 %v1651_v0  ;;  %v1298_v18 = vpack.c.bf16 %v458_v17, %v457_v16  ;;  %v1117_v19 = vld [vmem:[%s2015_s3] ss:$0 sm:$0xff]  ;;  %v455_v28 = vld [vmem:[#allocation10] sm:$0xff]  ;;  %v1301_v29 = vpack.c.bf16 %v460_v27, %v459_v26  ;;  %v456_v30 = vld [vmem:[#allocation10 + $0x8] sm:$0xff] }
  0xd9   :  { %1291 = vmatprep.subr.bf16.mxu1 %v1651_v0  ;;  %v1304_v31 = vpack.c.bf16 %v456_v30, %v455_v28  ;;  %v615_v32 = vld [vmem:[%s2023_s11] sm:$0xff]  ;;  %v616_v33 = vld [vmem:[%s2023_s11 + $0x8] sm:$0xff]  ;;  %v613_v39 = vld [vmem:[#allocation13] sm:$0xff] }
  0xda   :  { %1185 = vmatmul.mubr.msk.f32.vlgmr.msra.gmra.mrb[0].mxu0 %vm218_vm1, %v207_v8  ;;  %v208_v15 = vld [vmem:[%s2041_s24] sm:$0x3]  ;;  %v1307_v34 = vpack.c.bf16 %v616_v33, %v615_v32  ;;  %v775_v44 = vld [vmem:[#allocation16] sm:$0xff]  ;;  %v776_v45 = vld [vmem:[#allocation16 + $0x8] sm:$0xff] }
  0xdb   :  { %1202 = vmatprep.mubr.msk.f32.mxu0 %vm1652_vm0, %v1653_v1  ;;  %1296 = vmatpush3.bf16.msra.mxu0 %v1295_v11  ;;  %v1121_v36 = vld [vmem:[%s2018_s6] ss:$0 sm:$0xff]  ;;  %v1316_v46 = vpack.c.bf16 %v776_v45, %v775_v44  ;;  %v777_v47 = vld [vmem:[#allocation16 + $0x10] sm:$0xff]  ;;  %v919_v50 = vld [vmem:[#allocation17] sm:$0xff] }
  0xdc   :  { %1293 = vmatpush3.bf16.msra.mxu1 %v1292_v14  ;;  %1297 = vmatprep.subr.bf16.mxu0 %v1651_v0  ;;  %v614_v40 = vld [vmem:[#allocation13 + $0x8] sm:$0xff]  ;;  %v920_v51 = vld [vmem:[#allocation17 + $0x8] sm:$0xff]  ;;  %v921_v58 = vld [vmem:[#allocation17 + $0x10] sm:$0xff] }
  0xdd   :  { %1303 = vmatprep.subr.bf16.mxu1 %v1651_v0  ;;  %v1313_v42 = vpack.c.bf16 %v614_v40, %v613_v39  ;;  %v778_v48 = vld [vmem:[#allocation16 + $0x18] sm:$0xff]  ;;  %v1328_v52 = vpack.c.bf16 %v920_v51, %v919_v50  ;;  %v617_v55 = vld [vmem:[%s2023_s11 + $0x10] sm:$0xff]  ;;  %v771_v3 = vld [vmem:[#allocation14] sm:$0xff] }
  0xde   :  { %1203 = vmatmul.mubr.msk.f32.vlgmr.msra.gmra.mrb[2].mxu0 %vm218_vm1, %v208_v15  ;;  %v1319_v49 = vpack.c.bf16 %v778_v48, %v777_v47  ;;  %v618_v56 = vld [vmem:[%s2023_s11 + $0x18] sm:$0xff]  ;;  %v1124_v62 = vld [vmem:[%s2021_s9] ss:$0 sm:$0xff]  ;;  %v772_v4 = vld [vmem:[#allocation14 + $0x8] sm:$0xff] }
  0xdf   :  { %1213 = vmatprep.mubr.msk.f32.mxu0 %vm1652_vm0, %v1653_v1  ;;  %1299 = vmatpush3.bf16.msra.mxu0 %v1298_v18  ;;  %v1310_v57 = vpack.c.bf16 %v618_v56, %v617_v55  ;;  %v922_v59 = vld [vmem:[#allocation17 + $0x18] sm:$0xff]  ;;  %v1322_v6 = vpack.c.bf16 %v772_v4, %v771_v3  ;;  %v773_v10 = vld [vmem:[#allocation14 + $0x10] sm:$0xff]  ;;  %v995_v16 = vld [vmem:[#allocation19 + $0x8] sm:$0xff] }
  0xe0   :  { %1300 = vmatprep.subr.bf16.mxu0 %v1651_v0  ;;  %v1331_v60 = vpack.c.bf16 %v922_v59, %v921_v58  ;;  %v774_v11 = vld [vmem:[#allocation14 + $0x18] sm:$0xff]  ;;  %v996_v18 = vld [vmem:[#allocation19 + $0x10] sm:$0xff] }
  0xe1   :  { %v1325_v12 = vpack.c.bf16 %v774_v11, %v773_v10 }
  0xe3   :  { %1302 = vmatpush3.bf16.msra.mxu0 %v1301_v29 }
  0xe4   :  { %1312 = vmatprep.subr.bf16.mxu0 %v1651_v0 }
 0x1ad   :  { %v288_v20 = vpop.f32.mrb[0].mxu0 }
 0x1ae   :  { %v1935_v21 = vadd.f32 %v1117_v19, %v288_v20  ;;  %v1186_v22 = vpop.f32.mrb[1].mxu0  ;;  %v997_v19 = vld [vmem:[#allocation19 + $0x18] sm:$0xff] }
 0x1af   :  { %v1337_v20 = vpack.c.bf16 %v997_v19, %v996_v18 }
 0x1b0   :  { %v292_v23 = vmax.f32 %v1935_v21, 0.0  ;;  %v1127_v21 = vld [vmem:[%s2024_s12] ss:$0 sm:$0xff]  ;;  %s1654_s12 = smov [#allocation20]  }
 0x1b1   :  { %v442_v24 = vpop.f32.mrb[2].mxu0  ;;  %s1103_s27 = sshll.u32 %s1654_s12, 4  ;;  %s1104_s27 = int_to_ptr.vmem [resolvable:$true] %s1103_s27 }
 0x1b2   :  { %1196 = vmatmul.mubr.msk.f32.vlgmr.msra.gmra.mrb[0].mxu1 %vm299_vm2, %v292_v23  ;;  %v1204_v25 = vpop.f32.mrb[3].mxu0  ;;  %s1602_s20 = scalar_lea.vmem %s1104_s27, 32  ;;  %p1607_p5 = scmp.lt.s32.totalorder %s1104_s27, %s1104_s27 }
 0x1b3   :  { %1220 = vmatprep.mubr.msk.f32.mxu1 %vm1652_vm0, %v1653_v1  ;;  %1305 = vmatpush3.bf16.msra.mxu1 %v1304_v31  ;;  %v1080_v31 = vlaneseq  ;;  %p1603_p4 = scmp.ne.s32.totalorder %s1104_s27, %s1602_s20  ;;  %p1608_p6 = scmp.lt.s32.totalorder %s1602_s20, %s1602_s20 }
 0x1b4   :  { %1306 = vmatprep.subr.bf16.mxu1 %v1651_v0 }
 0x1b5   :  { %v1081_v32 = vand.u32 127, %v1080_v31  ;;  %p1609_p7 = por %p1608_p6, %p1607_p5 }
 0x1b6   :  { %1221 = vmatmul.mubr.msk.f32.vlgmr.msra.gmra.mrb[2].mxu1 %vm218_vm1, %v207_v8 }
 0x1b7   :  { %1231 = vmatprep.mubr.msk.f32.mxu1 %vm1652_vm0, %v1653_v1  ;;  %1308 = vmatpush3.bf16.msra.mxu1 %v1307_v34  ;;  %v1132_v34 = vld [vmem:[%s2042_s19] ss:$0 sm:$0xff]  ;;  %vm1082_vm3 = vcmp.lt.s32.totalorder %v1081_v32, 2  ;;  %p1610_p8 = pnand %p1609_p7, %p1603_p4 }
 0x1b8   :  { %1309 = vmatprep.subr.bf16.mxu1 %v1651_v0 }
 0x1bb   :  { %1311 = vmatpush3.bf16.msra.mxu1 %v1310_v57 }
 0x1bc   :  { %1321 = vmatprep.subr.bf16.mxu1 %v1651_v0 }
 0x285   :  { %v369_v35 = vpop.f32.mrb[0].mxu1 }
 0x286   :  { %v443_v37 = vadd.f32 %v442_v24, %v369_v35  ;;  %v1197_v38 = vpop.f32.mrb[1].mxu1 }
 0x288   :  { %v453_v41 = vadd.f32 %v1121_v36, %v443_v37 }
 0x289   :  { %v600_v53 = vpop.f32.mrb[2].mxu1 }
 0x28a   :  { %v454_v43 = vmax.f32 %v453_v41, 0.0  ;;  %v1222_v54 = vpop.f32.mrb[3].mxu1 }
 0x28c   :  { %1214 = vmatmul.mubr.msk.f32.vlgmr.msra.gmra.mrb[4].mxu0 %vm299_vm2, %v454_v43 }
 0x28d   :  { %1314 = vmatpush3.bf16.msra.mxu0 %v1313_v42  ;;  %1238 = vmatprep.mubr.msk.f32.mxu0 %vm1652_vm0, %v1653_v1 }
 0x28e   :  { %1315 = vmatprep.subr.bf16.mxu0 %v1651_v0 }
 0x290   :  { %1239 = vmatmul.mubr.msk.f32.vlgmr.msra.gmra.mrb[6].mxu0 %vm218_vm1, %v208_v15  ;;  %v994_v15 = vld [vmem:[#allocation19] sm:$0xff] }
 0x291   :  { %1317 = vmatpush3.bf16.msra.mxu0 %v1316_v46  ;;  %1249 = vmatprep.mubr.msk.f32.mxu0 %vm1652_vm0, %v1653_v1  ;;  %v1334_v17 = vpack.c.bf16 %v995_v16, %v994_v15 }
 0x292   :  { %1318 = vmatprep.subr.bf16.mxu0 %v1651_v0 }
 0x295   :  { %1320 = vmatpush3.bf16.msra.mxu0 %v1319_v49 }
 0x296   :  { %1327 = vmatprep.subr.bf16.mxu0 %v1651_v0 }
 0x298   :  { %1250 = vmatmul.mubr.msk.f32.vlgmr.msra.gmra.mrb[8].mxu0 %vm299_vm2, %v454_v43 }
 0x299   :  { %1271 = vmatprep.mubr.msk.f32.mxu0 %vm1652_vm0, %v1653_v1  ;;  %1329 = vmatpush3.bf16.msra.mxu0 %v1328_v52 }
 0x29a   :  { %1330 = vmatprep.subr.bf16.mxu0 %v1651_v0 }
 0x29d   :  { %1332 = vmatpush3.bf16.msra.mxu0 %v1331_v60 }
 0x35f   :  { %v530_v61 = vpop.f32.mrb[4].mxu0 }
 0x360   :  { %v601_v63 = vadd.f32 %v600_v53, %v530_v61  ;;  %v1215_v2 = vpop.f32.mrb[5].mxu0 }
 0x362   :  { %v611_v5 = vadd.f32 %v1124_v62, %v601_v63 }
 0x363   :  { %v758_v7 = vpop.f32.mrb[6].mxu0 }
 0x364   :  { %v612_v8 = vmax.f32 %v611_v5, 0.0  ;;  %v1240_v9 = vpop.f32.mrb[7].mxu0 }
 0x366   :  { %1232 = vmatmul.mubr.msk.f32.vlgmr.msra.gmra.mrb[4].mxu1 %vm299_vm2, %v612_v8  ;;  %1272 = vmatmul.mubr.msk.f32.vlgmr.msra.gmra.mrb[10].mxu0 %vm299_vm2, %v612_v8 }
 0x367   :  { %1323 = vmatpush3.bf16.msra.mxu1 %v1322_v6  ;;  %1260 = vmatprep.mubr.msk.f32.mxu1 %vm1652_vm0, %v1653_v1 }
 0x368   :  { %1324 = vmatprep.subr.bf16.mxu1 %v1651_v0 }
 0x36b   :  { %v845_v13 = vpop.f32.mrb[8].mxu0  ;;  %1326 = vmatpush3.bf16.msra.mxu1 %v1325_v12 }
 0x36c   :  { %v1251_v14 = vpop.f32.mrb[9].mxu0  ;;  %1333 = vmatprep.subr.bf16.mxu1 %v1651_v0 }
 0x36e   :  { %1261 = vmatmul.mubr.msk.f32.vlgmr.msra.gmra.mrb[6].mxu1 %vm299_vm2, %v292_v23 }
 0x36f   :  { %1282 = vmatprep.mubr.msk.f32.mxu1 %vm1652_vm0, %v1653_v1  ;;  %1335 = vmatpush3.bf16.msra.mxu1 %v1334_v17 }
 0x370   :  { %1336 = vmatprep.subr.bf16.mxu1 %v1651_v0 }
 0x373   :  { %1338 = vmatpush3.bf16.msra.mxu1 %v1337_v20 }
 0x439   :  { %v688_v22 = vpop.f32.mrb[4].mxu1  ;;  %v989_v24 = vpop.f32.mrb[10].mxu0 }
 0x43a   :  { %v759_v23 = vadd.f32 %v758_v7, %v688_v22  ;;  %v1233_v25 = vpop.f32.mrb[5].mxu1  ;;  %v1273_v26 = vpop.f32.mrb[11].mxu0 }
 0x43c   :  { %v769_v1 = vadd.f32 %v1127_v21, %v759_v23 }
 0x43e   :  { %v770_v27 = vmax.f32 %v769_v1, 0.0 }
 0x440   :  { %1283 = vmatmul.mubr.msk.f32.vlgmr.msra.gmra.mrb[8].mxu1 %vm299_vm2, %v770_v27 }
 0x441   :  { %v915_v28 = vpop.f32.mrb[6].mxu1 }
 0x442   :  { %v916_v29 = vadd.f32 %v915_v28, %v845_v13  ;;  %v1262_v0 = vpop.f32.mrb[7].mxu1 }
 0x444   :  { %v993_v30 = vadd.f32 %v989_v24, %v916_v29 }
 0x513   :  { %v1067_v33 = vpop.f32.mrb[8].mxu1 }
 0x514   :  { %v1071_v35 = vadd.f32 %v1067_v33, %v993_v30  ;;  %v1284_v36 = vpop.f32.mrb[9].mxu1 }
 0x516   :  { %v1079_v37 = vadd.f32 %v1132_v34, %v1071_v35 }
 0x518   :  { %v1083_v38 = vsel %vm1082_vm3, %v1079_v37, -1e+30 }
 0x519   :  { %v1085_v39 = vsel %vm1084_vm4, %v1083_v38, -inf }
 0x51a   :  { %1086 = vmax.xlane.f32.xlu0 %v1085_v39 }
 0x5a7   :  { %v1087_v40 = vpop.xlane.xlu0 %1086 }
 0x5a8   :  { %v1088_v41 = vsub.f32 %v1083_v38, %v1087_v40 }
 0x5aa   :  { %v1089_v42 = vmul.f32 1.442695, %v1088_v41 }
 0x5ac   :  { %1356 = vpow2.f32 %v1089_v42 }
 0x5b6   :  { %v1357_v43 = vpop.eup %1356 }
 0x5b7   :  { %v1091_v44 = vsel %vm1084_vm4, %v1357_v43, 0.0 }
 0x5b8   :  { %1092 = vadd.xlane.f32.xlu0 %v1091_v44 }
 0x645   :  { %v1093_v45 = vpop.xlane.xlu0 %1092 }
 0x646   :  { %1358 = vrcp.f32 %v1093_v45 }
 0x650   :  { %v1359_v46 = vpop.eup %1358 }
 0x651   :  { %v1095_v47 = vmul.f32 %v1359_v46, %v1357_v43 }
 0x653   :  { %1096 = vst [vmem:[#allocation20] sm:$0x3] %v1095_v47 }
 0x654   :  { %1613 = shalt.err (!%p1610_p8)
}
 0x655   :  { %s2043_s7 = sld [smem:[#allocation32_spill]] }
 0x65b   :  { %s1614_s5 = scalar_lea.hbm %s2043_s7, 32 }
 0x65c   :  { %p1615_p9 = scmp.ne.s32.totalorder %s2043_s7, %s1614_s5  ;;  %p1618_p10 = scmp.lt.u32.totalorder %s1614_s5, %s2043_s7 }
 0x65e   :  { %p1620_p11 = pnand %p1618_p10, %p1615_p9 }
 0x660   :  { %1623 = shalt.err (!%p1620_p11)
}
 0x661   :  { %1106 = dma.vmem_to_hbm [thread:$0]  %s1104_s27, 32, %s2043_s7, [#allocation4]  }
 0x662   :  { %1636 = dma.done.wait [#allocation4], 32  }
 0x663   :  { %1637 = vsyncadd [#allocation4], 4294967264 }
 0x664   :  { %1110 = vsyncpa [#allocation3], 1 }
 0x665   :  { %1111 = vsyncpa [#allocation6], 1 }
 0x666   :  { %1112 = vsyncpa [#allocation9], 1 }
 0x667   :  { %1113 = vsyncpa [#allocation12], 1 }
 0x668   :  { %1114 = vsyncpa [#allocation15], 1 }
 0x669   :  { %1115 = vsyncpa [#allocation18], 1 }
 0x66a   :  { %1116 = vsyncpa [#allocation4], 1 }

</bundles_post_ra>
